<compile_context>
chip_gen: v7x
topology: tpu7x:2x2x1
jax: 0.10.0
libtpu: 0.0.40
codegen_flags: <defaults>
</compile_context>

<pallas_src>
from functools import partial

import numpy as np
import jax
import jax.numpy as jnp
from jax.experimental import pallas as pl
from jax.experimental.pallas import tpu as pltpu

LANES = 128
MAX_BLOCK_ROWS = 2048   # 2048*128*4B = 1 MiB per input block (x2 inputs x2 bufs = 4 MiB VMEM)


# ----------------------------------------------------------------------------
# Pallas kernel: fused sigmoid + BCE-with-logits + dice statistics reduction.
# ----------------------------------------------------------------------------
def _bce_dice_kernel(pr_ref, gt_ref, out_ref,
                     tp_acc, sp_acc, sg_acc, bce_acc, *,
                     total, block_rows, needs_mask,
                     eps, lambda_dice, lambda_bce):
    i = pl.program_id(0)

    @pl.when(i == 0)
    def _init():
        tp_acc[...] = jnp.zeros_like(tp_acc)
        sp_acc[...] = jnp.zeros_like(sp_acc)
        sg_acc[...] = jnp.zeros_like(sg_acc)
        bce_acc[...] = jnp.zeros_like(bce_acc)

    x = pr_ref[...]                     # (block_rows, 128) logits, f32
    z = gt_ref[...]                     # (block_rows, 128) targets, f32

    p = 1.0 / (1.0 + jnp.exp(-x))       # sigmoid (exp on EUP)
    # numerically-stable BCE-with-logits, per element
    bce = jnp.maximum(x, 0.0) - x * z + jnp.log(1.0 + jnp.exp(-jnp.abs(x)))

    if needs_mask:                      # static Python bool: only if tail is padded
        row = jax.lax.broadcasted_iota(jnp.int32, x.shape, 0)
        col = jax.lax.broadcasted_iota(jnp.int32, x.shape, 1)
        flat = (i * block_rows + row) * LANES + col
        valid = flat < total
        zero = jnp.zeros_like(x)
        p = jnp.where(valid, p, zero)
        z = jnp.where(valid, z, zero)
        bce = jnp.where(valid, bce, zero)

    # Per-lane partial sums (sublane reduction only); lane reduce deferred.
    tp_acc[...] += jnp.sum(z * p, axis=0, keepdims=True)    # true positives
    sp_acc[...] += jnp.sum(p, axis=0, keepdims=True)        # sum sigmoid(pr)
    sg_acc[...] += jnp.sum(z, axis=0, keepdims=True)        # sum gt
    bce_acc[...] += jnp.sum(bce, axis=0, keepdims=True)     # sum of bce terms

    @pl.when(i == pl.num_programs(0) - 1)
    def _finalize():
        tp = jnp.sum(tp_acc[...], axis=1, keepdims=True)    # (1, 1)
        sp = jnp.sum(sp_acc[...], axis=1, keepdims=True)
        sg = jnp.sum(sg_acc[...], axis=1, keepdims=True)
        sb = jnp.sum(bce_acc[...], axis=1, keepdims=True)

        fp = sp - tp
        fn = sg - tp
        score = (2.0 * tp + eps) / (2.0 * tp + fn + fp + eps)   # beta = 1
        dice_loss = 1.0 - score
        bce_mean = sb * (1.0 / float(total))
        loss = lambda_dice * dice_loss + lambda_bce * bce_mean  # (1, 1)

        # Single aligned full-tile store of the (broadcast) scalar loss.
        out_ref[...] = jnp.broadcast_to(loss, out_ref.shape)


# ----------------------------------------------------------------------------
# Wrapper
# ----------------------------------------------------------------------------
def bce_dice_loss_pallas(y_pr, y_gt, *, eps=1e-7, lambda_dice=1.0, lambda_bce=1.0):
    """BCEDiceLoss.forward(y_pr, y_gt); y_pr are logits, y_gt targets in [0,1]."""
    assert y_pr.shape == y_gt.shape, (y_pr.shape, y_gt.shape)
    total = int(np.prod(y_pr.shape))

    pr = y_pr.reshape(-1).astype(jnp.float32)
    gt = y_gt.reshape(-1).astype(jnp.float32)

    rows = pl.cdiv(total, LANES)
    if rows <= MAX_BLOCK_ROWS:
        block_rows = max(8, ((rows + 7) // 8) * 8)       # single grid step
    else:
        block_rows = MAX_BLOCK_ROWS                      # stream in 1 MiB blocks
    rows_padded = ((rows + block_rows - 1) // block_rows) * block_rows
    padded_total = rows_padded * LANES
    needs_mask = padded_total != total

    if needs_mask:
        pr = jnp.pad(pr, (0, padded_total - total))
        gt = jnp.pad(gt, (0, padded_total - total))
    pr2 = pr.reshape(rows_padded, LANES)                 # lane-dense layout
    gt2 = gt.reshape(rows_padded, LANES)

    grid = (rows_padded // block_rows,)

    loss_tile = pl.pallas_call(
        partial(_bce_dice_kernel,
                total=total, block_rows=block_rows, needs_mask=needs_mask,
                eps=float(eps), lambda_dice=float(lambda_dice),
                lambda_bce=float(lambda_bce)),
        out_shape=jax.ShapeDtypeStruct((8, LANES), jnp.float32),
        grid_spec=pltpu.PrefetchScalarGridSpec(
            num_scalar_prefetch=0,
            grid=grid,
            in_specs=[
                pl.BlockSpec((block_rows, LANES), lambda i: (i, 0)),
                pl.BlockSpec((block_rows, LANES), lambda i: (i, 0)),
            ],
            out_specs=pl.BlockSpec((8, LANES), lambda i: (0, 0)),
            scratch_shapes=[pltpu.VMEM((1, LANES), jnp.float32)] * 4,
        ),
        compiler_params=pltpu.CompilerParams(
            # single accumulator across the grid -> reduction axis is sequential
            dimension_semantics=("arbitrary",)),
    )(pr2, gt2)

    return loss_tile[0, 0]


# ----------------------------------------------------------------------------
# Pure-JAX reference (mirrors the PyTorch BCEDiceLoss semantics).
# ----------------------------------------------------------------------------
def bce_dice_loss_ref(y_pr, y_gt, eps=1e-7, lambda_dice=1.0, lambda_bce=1.0):
    x = y_pr.astype(jnp.float32)
    z = y_gt.astype(jnp.float32)
    pr = 1.0 / (1.0 + jnp.exp(-x))
    tp = jnp.sum(z * pr)
    fp = jnp.sum(pr) - tp
    fn = jnp.sum(z) - tp
    score = (2.0 * tp + eps) / (2.0 * tp + fn + fp + eps)
    dice = 1.0 - score
    bce = jnp.mean(jnp.maximum(x, 0.0) - x * z + jnp.log(1.0 + jnp.exp(-jnp.abs(x))))
    return lambda_dice * dice + lambda_bce * bce


if __name__ == "__main__":
    key = jax.random.PRNGKey(0)
    kp, kg = jax.random.split(key)

    # y_pr: raw logits; y_gt: binary segmentation mask (as float).
    y_pr = jax.random.normal(kp, (2, 4, 16, 16), jnp.float32)
    y_gt = jax.random.bernoulli(kg, 0.3, (2, 4, 16, 16)).astype(jnp.float32)

    loss = jax.block_until_ready(bce_dice_loss_pallas(y_pr, y_gt))
    ref = jax.block_until_ready(bce_dice_loss_ref(y_pr, y_gt))

    np.testing.assert_allclose(np.asarray(loss), np.asarray(ref),
                               rtol=1e-5, atol=1e-5)
    print("KERNEL_OK")
</pallas_src>

<mosaic_0001>
module attributes {stable_mosaic.version = 11 : i64} {
  func.func @_bce_dice_kernel(%arg0: i32, %arg1: memref<16x128xf32, #tpu.memory_space<vmem>>, %arg2: memref<16x128xf32, #tpu.memory_space<vmem>>, %arg3: memref<8x128xf32, #tpu.memory_space<vmem>>, %arg4: memref<1x128xf32, #tpu.memory_space<vmem>>, %arg5: memref<1x128xf32, #tpu.memory_space<vmem>>, %arg6: memref<1x128xf32, #tpu.memory_space<vmem>>, %arg7: memref<1x128xf32, #tpu.memory_space<vmem>>) attributes {dimension_semantics = [#tpu.dimension_semantics<arbitrary>], iteration_bounds = array<i64: 1>, scalar_prefetch = 0 : i64, scratch_operands = 4 : i64, tpu.core_type = #tpu.core_type<tc>, window_params = [{transform_indices = @transform_0, window_bounds = array<i64: 16, 128>}, {transform_indices = @transform_1, window_bounds = array<i64: 16, 128>}, {pipeline_mode = #tpu.pipeline_mode<synchronous>, transform_indices = @transform_2, window_bounds = array<i64: 8, 128>}]} {
    %c0_i32 = arith.constant 0 : i32
    %0 = arith.cmpi eq, %arg0, %c0_i32 : i32
    %1 = arith.extui %0 : i1 to i32
    %c0_i32_0 = arith.constant 0 : i32
    %2 = arith.cmpi ne, %1, %c0_i32_0 : i32
    scf.if %2 {
      %cst_31 = arith.constant 0.000000e+00 : f32
      %48 = vector.broadcast %cst_31 : f32 to vector<1x128xf32>
      %c0_32 = arith.constant 0 : index
      %c0_33 = arith.constant 0 : index
      %49 = vector.load %arg4[%c0_32, %c0_33] : memref<1x128xf32, #tpu.memory_space<vmem>>, vector<1x128xf32>
      tpu.vector_store %arg4[%c0_32, %c0_33], %48 {strides = array<i32>} : memref<1x128xf32, #tpu.memory_space<vmem>>, vector<1x128xf32>,
      %cst_34 = arith.constant 0.000000e+00 : f32
      %50 = vector.broadcast %cst_34 : f32 to vector<1x128xf32>
      %c0_35 = arith.constant 0 : index
      %c0_36 = arith.constant 0 : index
      %51 = vector.load %arg5[%c0_35, %c0_36] : memref<1x128xf32, #tpu.memory_space<vmem>>, vector<1x128xf32>
      tpu.vector_store %arg5[%c0_35, %c0_36], %50 {strides = array<i32>} : memref<1x128xf32, #tpu.memory_space<vmem>>, vector<1x128xf32>,
      %cst_37 = arith.constant 0.000000e+00 : f32
      %52 = vector.broadcast %cst_37 : f32 to vector<1x128xf32>
      %c0_38 = arith.constant 0 : index
      %c0_39 = arith.constant 0 : index
      %53 = vector.load %arg6[%c0_38, %c0_39] : memref<1x128xf32, #tpu.memory_space<vmem>>, vector<1x128xf32>
      tpu.vector_store %arg6[%c0_38, %c0_39], %52 {strides = array<i32>} : memref<1x128xf32, #tpu.memory_space<vmem>>, vector<1x128xf32>,
      %cst_40 = arith.constant 0.000000e+00 : f32
      %54 = vector.broadcast %cst_40 : f32 to vector<1x128xf32>
      %c0_41 = arith.constant 0 : index
      %c0_42 = arith.constant 0 : index
      %55 = vector.load %arg7[%c0_41, %c0_42] : memref<1x128xf32, #tpu.memory_space<vmem>>, vector<1x128xf32>
      tpu.vector_store %arg7[%c0_41, %c0_42], %54 {strides = array<i32>} : memref<1x128xf32, #tpu.memory_space<vmem>>, vector<1x128xf32>,
    } else {
    }
    %c0 = arith.constant 0 : index
    %c0_1 = arith.constant 0 : index
    %3 = vector.load %arg1[%c0, %c0_1] : memref<16x128xf32, #tpu.memory_space<vmem>>, vector<16x128xf32>
    %c0_2 = arith.constant 0 : index
    %c0_3 = arith.constant 0 : index
    %4 = vector.load %arg2[%c0_2, %c0_3] : memref<16x128xf32, #tpu.memory_space<vmem>>, vector<16x128xf32>
    %cst = arith.constant 0.000000e+00 : f32
    %5 = vector.broadcast %cst : f32 to vector<16x128xf32>
    %6 = arith.subf %5, %3 : vector<16x128xf32>
    %7 = math.exp %6 : vector<16x128xf32>
    %cst_4 = arith.constant 1.000000e+00 : f32
    %8 = vector.broadcast %cst_4 : f32 to vector<16x128xf32>
    %9 = arith.addf %8, %7 : vector<16x128xf32>
    %cst_5 = arith.constant 1.000000e+00 : f32
    %10 = vector.broadcast %cst_5 : f32 to vector<16x128xf32>
    %11 = arith.divf %10, %9 : vector<16x128xf32>
    %cst_6 = arith.constant 0.000000e+00 : f32
    %12 = vector.broadcast %cst_6 : f32 to vector<16x128xf32>
    %13 = arith.maximumf %3, %12 : vector<16x128xf32>
    %14 = arith.mulf %3, %4 : vector<16x128xf32>
    %15 = arith.subf %13, %14 : vector<16x128xf32>
    %16 = math.absf %3 : vector<16x128xf32>
    %cst_7 = arith.constant 0.000000e+00 : f32
    %17 = vector.broadcast %cst_7 : f32 to vector<16x128xf32>
    %18 = arith.subf %17, %16 : vector<16x128xf32>
    %19 = math.exp %18 : vector<16x128xf32>
    %cst_8 = arith.constant 1.000000e+00 : f32
    %20 = vector.broadcast %cst_8 : f32 to vector<16x128xf32>
    %21 = arith.addf %20, %19 : vector<16x128xf32>
    %22 = math.log %21 : vector<16x128xf32>
    %23 = arith.addf %15, %22 : vector<16x128xf32>
    %c0_9 = arith.constant 0 : index
    %c0_10 = arith.constant 0 : index
    %24 = vector.load %arg4[%c0_9, %c0_10] : memref<1x128xf32, #tpu.memory_space<vmem>>, vector<1x128xf32>
    %25 = arith.mulf %4, %11 : vector<16x128xf32>
    %cst_11 = arith.constant dense<0.000000e+00> : vector<128xf32>
    %26 = vector.multi_reduction <add>, %25, %cst_11 [0] : vector<16x128xf32> to vector<128xf32>
    %27 = vector.shape_cast %26 : vector<128xf32> to vector<1x128xf32>
    %28 = arith.addf %24, %27 : vector<1x128xf32>
    %c0_12 = arith.constant 0 : index
    %c0_13 = arith.constant 0 : index
    %29 = vector.load %arg4[%c0_12, %c0_13] : memref<1x128xf32, #tpu.memory_space<vmem>>, vector<1x128xf32>
    tpu.vector_store %arg4[%c0_12, %c0_13], %28 {strides = array<i32>} : memref<1x128xf32, #tpu.memory_space<vmem>>, vector<1x128xf32>,
    %c0_14 = arith.constant 0 : index
    %c0_15 = arith.constant 0 : index
    %30 = vector.load %arg5[%c0_14, %c0_15] : memref<1x128xf32, #tpu.memory_space<vmem>>, vector<1x128xf32>
    %cst_16 = arith.constant dense<0.000000e+00> : vector<128xf32>
    %31 = vector.multi_reduction <add>, %11, %cst_16 [0] : vector<16x128xf32> to vector<128xf32>
    %32 = vector.shape_cast %31 : vector<128xf32> to vector<1x128xf32>
    %33 = arith.addf %30, %32 : vector<1x128xf32>
    %c0_17 = arith.constant 0 : index
    %c0_18 = arith.constant 0 : index
    %34 = vector.load %arg5[%c0_17, %c0_18] : memref<1x128xf32, #tpu.memory_space<vmem>>, vector<1x128xf32>
    tpu.vector_store %arg5[%c0_17, %c0_18], %33 {strides = array<i32>} : memref<1x128xf32, #tpu.memory_space<vmem>>, vector<1x128xf32>,
    %c0_19 = arith.constant 0 : index
    %c0_20 = arith.constant 0 : index
    %35 = vector.load %arg6[%c0_19, %c0_20] : memref<1x128xf32, #tpu.memory_space<vmem>>, vector<1x128xf32>
    %cst_21 = arith.constant dense<0.000000e+00> : vector<128xf32>
    %36 = vector.multi_reduction <add>, %4, %cst_21 [0] : vector<16x128xf32> to vector<128xf32>
    %37 = vector.shape_cast %36 : vector<128xf32> to vector<1x128xf32>
    %38 = arith.addf %35, %37 : vector<1x128xf32>
    %c0_22 = arith.constant 0 : index
    %c0_23 = arith.constant 0 : index
    %39 = vector.load %arg6[%c0_22, %c0_23] : memref<1x128xf32, #tpu.memory_space<vmem>>, vector<1x128xf32>
    tpu.vector_store %arg6[%c0_22, %c0_23], %38 {strides = array<i32>} : memref<1x128xf32, #tpu.memory_space<vmem>>, vector<1x128xf32>,
    %c0_24 = arith.constant 0 : index
    %c0_25 = arith.constant 0 : index
    %40 = vector.load %arg7[%c0_24, %c0_25] : memref<1x128xf32, #tpu.memory_space<vmem>>, vector<1x128xf32>
    %cst_26 = arith.constant dense<0.000000e+00> : vector<128xf32>
    %41 = vector.multi_reduction <add>, %23, %cst_26 [0] : vector<16x128xf32> to vector<128xf32>
    %42 = vector.shape_cast %41 : vector<128xf32> to vector<1x128xf32>
    %43 = arith.addf %40, %42 : vector<1x128xf32>
    %c0_27 = arith.constant 0 : index
    %c0_28 = arith.constant 0 : index
    %44 = vector.load %arg7[%c0_27, %c0_28] : memref<1x128xf32, #tpu.memory_space<vmem>>, vector<1x128xf32>
    tpu.vector_store %arg7[%c0_27, %c0_28], %43 {strides = array<i32>} : memref<1x128xf32, #tpu.memory_space<vmem>>, vector<1x128xf32>,
    %c0_i32_29 = arith.constant 0 : i32
    %45 = arith.cmpi eq, %arg0, %c0_i32_29 : i32
    %46 = arith.extui %45 : i1 to i32
    %c0_i32_30 = arith.constant 0 : i32
    %47 = arith.cmpi ne, %46, %c0_i32_30 : i32
    scf.if %47 {
      %c0_31 = arith.constant 0 : index
      %c0_32 = arith.constant 0 : index
      %48 = vector.load %arg4[%c0_31, %c0_32] : memref<1x128xf32, #tpu.memory_space<vmem>>, vector<1x128xf32>
      %cst_33 = arith.constant dense<0.000000e+00> : vector<1xf32>
      %49 = vector.multi_reduction <add>, %48, %cst_33 [1] : vector<1x128xf32> to vector<1xf32>
      %50 = vector.shape_cast %49 : vector<1xf32> to vector<1x1xf32>
      %c0_34 = arith.constant 0 : index
      %c0_35 = arith.constant 0 : index
      %51 = vector.load %arg5[%c0_34, %c0_35] : memref<1x128xf32, #tpu.memory_space<vmem>>, vector<1x128xf32>
      %cst_36 = arith.constant dense<0.000000e+00> : vector<1xf32>
      %52 = vector.multi_reduction <add>, %51, %cst_36 [1] : vector<1x128xf32> to vector<1xf32>
      %53 = vector.shape_cast %52 : vector<1xf32> to vector<1x1xf32>
      %c0_37 = arith.constant 0 : index
      %c0_38 = arith.constant 0 : index
      %54 = vector.load %arg6[%c0_37, %c0_38] : memref<1x128xf32, #tpu.memory_space<vmem>>, vector<1x128xf32>
      %cst_39 = arith.constant dense<0.000000e+00> : vector<1xf32>
      %55 = vector.multi_reduction <add>, %54, %cst_39 [1] : vector<1x128xf32> to vector<1xf32>
      %56 = vector.shape_cast %55 : vector<1xf32> to vector<1x1xf32>
      %c0_40 = arith.constant 0 : index
      %c0_41 = arith.constant 0 : index
      %57 = vector.load %arg7[%c0_40, %c0_41] : memref<1x128xf32, #tpu.memory_space<vmem>>, vector<1x128xf32>
      %cst_42 = arith.constant dense<0.000000e+00> : vector<1xf32>
      %58 = vector.multi_reduction <add>, %57, %cst_42 [1] : vector<1x128xf32> to vector<1xf32>
      %59 = vector.shape_cast %58 : vector<1xf32> to vector<1x1xf32>
      %60 = arith.subf %53, %50 : vector<1x1xf32>
      %61 = arith.subf %56, %50 : vector<1x1xf32>
      %cst_43 = arith.constant 2.000000e+00 : f32
      %62 = vector.broadcast %cst_43 : f32 to vector<1x1xf32>
      %63 = arith.mulf %62, %50 : vector<1x1xf32>
      %cst_44 = arith.constant 1.000000e-07 : f32
      %64 = vector.broadcast %cst_44 : f32 to vector<1x1xf32>
      %65 = arith.addf %63, %64 : vector<1x1xf32>
      %cst_45 = arith.constant 2.000000e+00 : f32
      %66 = vector.broadcast %cst_45 : f32 to vector<1x1xf32>
      %67 = arith.mulf %66, %50 : vector<1x1xf32>
      %68 = arith.addf %67, %61 : vector<1x1xf32>
      %69 = arith.addf %68, %60 : vector<1x1xf32>
      %cst_46 = arith.constant 1.000000e-07 : f32
      %70 = vector.broadcast %cst_46 : f32 to vector<1x1xf32>
      %71 = arith.addf %69, %70 : vector<1x1xf32>
      %72 = arith.divf %65, %71 : vector<1x1xf32>
      %cst_47 = arith.constant 1.000000e+00 : f32
      %73 = vector.broadcast %cst_47 : f32 to vector<1x1xf32>
      %74 = arith.subf %73, %72 : vector<1x1xf32>
      %cst_48 = arith.constant 4.8828125E-4 : f32
      %75 = vector.broadcast %cst_48 : f32 to vector<1x1xf32>
      %76 = arith.mulf %59, %75 : vector<1x1xf32>
      %cst_49 = arith.constant 1.000000e+00 : f32
      %77 = vector.broadcast %cst_49 : f32 to vector<1x1xf32>
      %78 = arith.mulf %77, %74 : vector<1x1xf32>
      %cst_50 = arith.constant 1.000000e+00 : f32
      %79 = vector.broadcast %cst_50 : f32 to vector<1x1xf32>
      %80 = arith.mulf %79, %76 : vector<1x1xf32>
      %81 = arith.addf %78, %80 : vector<1x1xf32>
      %82 = vector.shape_cast %81 : vector<1x1xf32> to vector<1x1xf32>
      %83 = vector.broadcast %82 : vector<1x1xf32> to vector<8x128xf32>
      %c0_51 = arith.constant 0 : index
      %c0_52 = arith.constant 0 : index
      %84 = vector.load %arg3[%c0_51, %c0_52] : memref<8x128xf32, #tpu.memory_space<vmem>>, vector<8x128xf32>
      tpu.vector_store %arg3[%c0_51, %c0_52], %83 {strides = array<i32>} : memref<8x128xf32, #tpu.memory_space<vmem>>, vector<8x128xf32>,
    } else {
    }
    return
  }
  func.func @transform_0(%arg0: i32) -> (i32, i32) {
    %c0_i32 = arith.constant 0 : i32
    %c0_i32_0 = arith.constant 0 : i32
    return %arg0, %c0_i32 : i32, i32
  }
  func.func @transform_1(%arg0: i32) -> (i32, i32) {
    %c0_i32 = arith.constant 0 : i32
    %c0_i32_0 = arith.constant 0 : i32
    return %arg0, %c0_i32 : i32, i32
  }
  func.func @transform_2(%arg0: i32) -> (i32, i32) {
    %c0_i32 = arith.constant 0 : i32
    %c0_i32_0 = arith.constant 0 : i32
    %c0_i32_1 = arith.constant 0 : i32
    return %c0_i32, %c0_i32_0 : i32, i32
  }
}

</mosaic_0001>

<bundles_post_ra>
// kernel: tpu_custom_call.1
= control target key start
LH: loop header
LB: loop body
LE: loop exit
PB: predicated region body
PF: predicated region fallthrough
CT: control target
= control target key end

     0   :  { %7 = vsyncpa [#allocation7], 0  ;;  %s334_s0 = inlined_call_operand.hbm [shape: f32[16,128], index: 0, kind: input, shape index: {}]   ;;  %s335_s1 = inlined_call_operand.hbm [shape: f32[16,128], index: 1, kind: input, shape index: {}]   ;;  %s336_s2 = inlined_call_operand.hbm [shape: f32[8,128], index: 2, kind: output, shape index: {}]  }
   0x1   :  { %8 = vsyncpa [#allocation10], 0 }
   0x2   :  { %9 = vsyncpa [#allocation8], 0  ;;  %s277_s9 = smov [#allocation6]   ;;  %s205_s13 = scalar_lea.hbm %s334_s0, 256 }
   0x3   :  { %s15_s10 = sshll.u32 %s277_s9, 4  ;;  %p206_p0 = scmp.ne.s32.totalorder %s334_s0, %s205_s13  ;;  %s16_s10 = int_to_ptr.vmem [resolvable:$true] %s15_s10 }
   0x4   :  { %p209_p1 = scmp.lt.u32.totalorder %s205_s13, %s334_s0 }
   0x6   :  { %p211_p2 = pnand %p209_p1, %p206_p0 }
   0x8   :  { %214 = shalt.err (!%p211_p2)
}
   0x9   :  { %s215_s18 = scalar_lea.vmem %s16_s10, 256  ;;  %p220_p4 = scmp.lt.s32.totalorder %s16_s10, %s16_s10 }
   0xa   :  { %p216_p3 = scmp.ne.s32.totalorder %s16_s10, %s215_s18  ;;  %p221_p5 = scmp.lt.s32.totalorder %s215_s18, %s215_s18 }
   0xc   :  { %p222_p6 = por %p221_p5, %p220_p4 }
   0xe   :  { %p223_p7 = pnand %p222_p6, %p216_p3 }
  0x10   :  { %226 = shalt.err (!%p223_p7)
}
  0x11   :  { %s278_s19 = smov 128   ;;  %s279_s20 = smov 8  }
  0x12   :  { %21 = dma.hbm_to_vmem [thread:$0]  %s334_s0, 256, %s16_s10, [#allocation7], %s278_s19, %s278_s19, %s279_s20  }
  0x13   :  { %s280_s23 = smov [#allocation9]   ;;  %s227_s27 = scalar_lea.hbm %s335_s1, 256 }
  0x14   :  { %s27_s24 = sshll.u32 %s280_s23, 4  ;;  %p228_p8 = scmp.ne.s32.totalorder %s335_s1, %s227_s27  ;;  %s28_s24 = int_to_ptr.vmem [resolvable:$true] %s27_s24 }
  0x15   :  { %p231_p9 = scmp.lt.u32.totalorder %s227_s27, %s335_s1 }
  0x17   :  { %p233_p10 = pnand %p231_p9, %p228_p8 }
  0x19   :  { %236 = shalt.err (!%p233_p10)
}
  0x1a   :  { %s237_s4 = scalar_lea.vmem %s28_s24, 256  ;;  %p242_p12 = scmp.lt.s32.totalorder %s28_s24, %s28_s24 }
  0x1b   :  { %p238_p11 = scmp.ne.s32.totalorder %s28_s24, %s237_s4  ;;  %p243_p13 = scmp.lt.s32.totalorder %s237_s4, %s237_s4 }
  0x1d   :  { %p244_p0 = por %p243_p13, %p242_p12 }
  0x1f   :  { %p245_p1 = pnand %p244_p0, %p238_p11 }
  0x21   :  { %248 = shalt.err (!%p245_p1)
}
  0x22   :  { %33 = dma.hbm_to_vmem [thread:$0]  %s335_s1, 256, %s28_s24, [#allocation10], %s278_s19, %s278_s19, %s279_s20  }
  0x23   :  { %271 = dma.done.wait [#allocation7], 256  }
  0x24   :  { %272 = vsyncadd [#allocation7], 4294967040 }
  0x25   :  { %273 = dma.done.wait [#allocation10], 256  }
  0x26   :  { %274 = vsyncadd [#allocation10], 4294967040  ;;  %v281_v0 = vmov 0.0   ;;  %v48_v1 = vld [vmem:[#allocation6] sm:$0xff]  ;;  %v49_v2 = vld [vmem:[#allocation6 + $0x8] sm:$0xff]  ;;  %vm132_vm0 = vcmask 1040384  }
  0x27   :  { %45 = vst [vmem:[#allocation3] sm:$0x1] %v281_v0  ;;  %44 = vst [vmem:[#allocation2] sm:$0x1] %v281_v0  ;;  %v52_v3 = vsub.f32 0.0, %v48_v1  ;;  %v53_v4 = vsub.f32 0.0, %v49_v2 }
  0x28   :  { %46 = vst [vmem:[#allocation4] sm:$0x1] %v281_v0  ;;  %47 = vst [vmem:[#allocation5] sm:$0x1] %v281_v0  ;;  %v50_v5 = vld [vmem:[#allocation9] sm:$0xff]  ;;  %v51_v6 = vld [vmem:[#allocation9 + $0x8] sm:$0xff] }
  0x29   :  { %v109_v7 = vadd.f32 %v51_v6, %v50_v5  ;;  %v54_v8 = vmul.f32 1.442695, %v52_v3  ;;  %v56_v9 = vmul.f32 1.442695, %v53_v4  ;;  %v70_v10 = vand.u32 2147483647, %v48_v1 }
  0x2a   :  { %v71_v12 = vand.u32 2147483647, %v49_v2  ;;  %v66_v32 = vmul.f32 %v50_v5, %v48_v1  ;;  %v64_v33 = vmax.f32 %v48_v1, 0.0  ;;  %v67_v35 = vmul.f32 %v51_v6, %v49_v2  ;;  %s282_s1 = smov [#allocation11]  }
  0x2b   :  { %v110_v11 = vrot.slane %v109_v7, 4  ;;  %187 = vpow2.f32 %v54_v8  ;;  %v72_v13 = vsub.f32 0.0, %v70_v10  ;;  %v65_v36 = vmax.f32 %v49_v2, 0.0  ;;  %s171_s6 = sshll.u32 %s282_s1, 4  ;;  %s172_s6 = int_to_ptr.vmem [resolvable:$true] %s171_s6 }
  0x2c   :  { %189 = vpow2.f32 %v56_v9  ;;  %v73_v15 = vsub.f32 0.0, %v71_v12  ;;  %v68_v41 = vsub.f32 %v64_v33, %v66_v32  ;;  %s249_s7 = scalar_lea.vmem %s172_s6, 128  ;;  %p254_p3 = scmp.lt.s32.totalorder %s172_s6, %s172_s6 }
  0x2d   :  { %v111_v14 = vadd.f32 %v110_v11, %v109_v7  ;;  %v74_v16 = vmul.f32 1.442695, %v72_v13  ;;  %v69_v45 = vsub.f32 %v65_v36, %v67_v35  ;;  %p250_p2 = scmp.ne.s32.totalorder %s172_s6, %s249_s7  ;;  %p255_p4 = scmp.lt.s32.totalorder %s249_s7, %s249_s7 }
  0x2e   :  { %v76_v18 = vmul.f32 1.442695, %v73_v15  ;;  %v98_v61 = vld [vmem:[#allocation3] sm:$0x1]  ;;  %v86_v1 = vld [vmem:[#allocation2] sm:$0x1] }
  0x2f   :  { %v112_v17 = vrot.slane %v111_v14, 2  ;;  %191 = vpow2.f32 %v74_v16  ;;  %v108_v21 = vld [vmem:[#allocation4] sm:$0x1]  ;;  %v118_v8 = vld [vmem:[#allocation5] sm:$0x1]  ;;  %p256_p5 = por %p255_p4, %p254_p3 }
  0x30   :  { %193 = vpow2.f32 %v76_v18 }
  0x31   :  { %v113_v19 = vadd.f32 %v112_v17, %v111_v14  ;;  %p257_p6 = pnand %p256_p5, %p250_p2 }
  0x33   :  { %v114_v20 = vrot.slane %v113_v19, 1 }
  0x35   :  { %v115_v22 = vadd.f32 %v114_v20, %v113_v19  ;;  %v188_v23 = vpop.eup %187 }
  0x36   :  { %v190_v24 = vpop.eup %189  ;;  %v58_v25 = vadd.f32 1.0, %v188_v23 }
  0x37   :  { %v116_v26 = vadd.f32 %v115_v22, %v108_v21  ;;  %v59_v27 = vadd.f32 1.0, %v190_v24 }
  0x38   :  { %195 = vrcp.f32 %v58_v25 }
  0x39   :  { %117 = vst [vmem:[#allocation4] sm:$0x1] %v116_v26  ;;  %v192_v28 = vpop.eup %191  ;;  %197 = vrcp.f32 %v59_v27 }
  0x3a   :  { %v194_v29 = vpop.eup %193  ;;  %v78_v30 = vadd.f32 1.0, %v192_v28  ;;  %v160_v28 = vlaneseq }
  0x3b   :  { %v79_v31 = vadd.f32 1.0, %v194_v29 }
  0x3c   :  { %199 = vlog2.f32 %v78_v30 }
  0x3d   :  { %201 = vlog2.f32 %v79_v31  ;;  %v161_v31 = vshrl.u32 %v160_v28, 7 }
  0x3f   :  { %v162_v36 = vsub.s32 0, %v161_v31 }
  0x40   :  { %v140_v14 = vld [vmem:[#allocation4] sm:$0x1] }
  0x41   :  { %v141_v16 = vsel %vm132_vm0, %v140_v14, 0.0 }
  0x42   :  { %v196_v34 = vpop.eup %195 }
  0x43   :  { %v198_v37 = vpop.eup %197  ;;  %v87_v38 = vmul.f32 %v196_v34, %v50_v5 }
  0x44   :  { %v99_v39 = vadd.f32 %v198_v37, %v196_v34  ;;  %v88_v40 = vmul.f32 %v198_v37, %v51_v6 }
  0x46   :  { %v200_v42 = vpop.eup %199  ;;  %v100_v43 = vrot.slane %v99_v39, 4  ;;  %v89_v44 = vadd.f32 %v88_v40, %v87_v38 }
  0x47   :  { %v202_v46 = vpop.eup %201  ;;  %v81_v47 = vmul.f32 0.6931472, %v200_v42 }
  0x48   :  { %v101_v48 = vadd.f32 %v100_v43, %v99_v39  ;;  %v90_v49 = vrot.slane %v89_v44, 4  ;;  %v83_v50 = vmul.f32 0.6931472, %v202_v46 }
  0x49   :  { %v84_v51 = vadd.f32 %v81_v47, %v68_v41 }
  0x4a   :  { %v102_v52 = vrot.slane %v101_v48, 2  ;;  %v91_v53 = vadd.f32 %v90_v49, %v89_v44  ;;  %v85_v54 = vadd.f32 %v83_v50, %v69_v45 }
  0x4c   :  { %v103_v55 = vadd.f32 %v102_v52, %v101_v48  ;;  %v92_v56 = vrot.slane %v91_v53, 2  ;;  %v119_v57 = vadd.f32 %v85_v54, %v84_v51 }
  0x4e   :  { %v104_v58 = vrot.slane %v103_v55, 1  ;;  %v93_v59 = vadd.f32 %v92_v56, %v91_v53  ;;  %v120_v60 = vrot.slane %v119_v57, 4 }
  0x50   :  { %v105_v62 = vadd.f32 %v104_v58, %v103_v55  ;;  %v94_v63 = vrot.slane %v93_v59, 1  ;;  %v121_v0 = vadd.f32 %v120_v60, %v119_v57 }
  0x52   :  { %v106_v2 = vadd.f32 %v105_v62, %v98_v61  ;;  %v95_v3 = vadd.f32 %v94_v63, %v93_v59  ;;  %v122_v4 = vrot.slane %v121_v0, 2 }
  0x54   :  { %107 = vst [vmem:[#allocation3] sm:$0x1] %v106_v2  ;;  %v96_v5 = vadd.f32 %v95_v3, %v86_v1  ;;  %v123_v6 = vadd.f32 %v122_v4, %v121_v0 }
  0x56   :  { %97 = vst [vmem:[#allocation2] sm:$0x1] %v96_v5  ;;  %v124_v7 = vrot.slane %v123_v6, 1 }
  0x58   :  { %v125_v9 = vadd.f32 %v124_v7, %v123_v6 }
  0x5a   :  { %v126_v10 = vadd.f32 %v125_v9, %v118_v8 }
  0x5b   :  { %v136_v11 = vld [vmem:[#allocation3] sm:$0x1] }
  0x5c   :  { %v137_v12 = vsel %vm132_vm0, %v136_v11, 0.0  ;;  %127 = vst [vmem:[#allocation5] sm:$0x1] %v126_v10 }
  0x5d   :  { %138 = vadd.xlane.f32.xlu1 %v137_v12  ;;  %v131_v13 = vld [vmem:[#allocation2] sm:$0x1] }
  0x5e   :  { %v133_v15 = vsel %vm132_vm0, %v131_v13, 0.0 }
  0x5f   :  { %134 = vadd.xlane.f32.xlu0 %v133_v15 }
  0x63   :  { %142 = vadd.xlane.f32.xlu0 %v141_v16  ;;  %v144_v17 = vld [vmem:[#allocation5] sm:$0x1] }
  0x64   :  { %v145_v18 = vsel %vm132_vm0, %v144_v17, 0.0 }
  0x65   :  { %146 = vadd.xlane.f32.xlu1 %v145_v18 }
  0xea   :  { %v139_v20 = vpop.xlane.xlu1 %138 }
  0xec   :  { %v135_v19 = vpop.xlane.xlu0 %134 }
  0xed   :  { %v150_v22 = vmul.f32 2.0, %v135_v19  ;;  %v148_v24 = vsub.f32 %v139_v20, %v135_v19 }
  0xef   :  { %v151_v30 = vadd.f32 1e-07, %v150_v22 }
  0xf0   :  { %v143_v21 = vpop.xlane.xlu0 %142 }
  0xf1   :  { %v149_v23 = vsub.f32 %v143_v21, %v135_v19 }
  0xf2   :  { %v147_v29 = vpop.xlane.xlu1 %146 }
  0xf3   :  { %v152_v25 = vadd.f32 %v150_v22, %v149_v23  ;;  %v158_v34 = vmul.f32 0.00048828125, %v147_v29 }
  0xf5   :  { %v153_v26 = vadd.f32 %v152_v25, %v148_v24 }
  0xf7   :  { %v154_v27 = vadd.f32 1e-07, %v153_v26 }
  0xf9   :  { %203 = vrcp.f32 %v154_v27 }
 0x103   :  { %v204_v32 = vpop.eup %203 }
 0x104   :  { %v156_v33 = vmul.f32 %v204_v32, %v151_v30 }
 0x106   :  { %v157_v35 = vsub.f32 1.0, %v156_v33 }
 0x108   :  { %v159_v37 = vadd.f32 %v158_v34, %v157_v35 }
 0x10a   :  { %v163_v38 = vrot.slane %v159_v37, %v162_v36 }
 0x10c   :  { %164 = vst [vmem:[#allocation11] sm:$0xff] %v163_v38 }
 0x10d   :  { %260 = shalt.err (!%p257_p6)
}
 0x10e   :  { %s261_s10 = scalar_lea.hbm %s336_s2, 128 }
 0x10f   :  { %p262_p7 = scmp.ne.s32.totalorder %s336_s2, %s261_s10  ;;  %p265_p8 = scmp.lt.u32.totalorder %s261_s10, %s336_s2 }
 0x111   :  { %p267_p9 = pnand %p265_p8, %p262_p7 }
 0x113   :  { %270 = shalt.err (!%p267_p9)
}
 0x114   :  { %174 = dma.vmem_to_hbm [thread:$0]  %s172_s6, 128, %s336_s2, [#allocation8]  }
 0x115   :  { %275 = dma.done.wait [#allocation8], 128  }
 0x116   :  { %276 = vsyncadd [#allocation8], 4294967168 }
 0x117   :  { %178 = vsyncpa [#allocation7], 1 }
 0x118   :  { %179 = vsyncpa [#allocation10], 1 }
 0x119   :  { %180 = vsyncpa [#allocation8], 1 }

</bundles_post_ra>
